<compile_context>
chip_gen: v6e
topology: v6e:2x2x1
jax: 0.10.0
libtpu: 0.0.40
codegen_flags: <defaults>
</compile_context>

<pallas_src>
import math
import numpy as np
import jax
import jax.numpy as jnp
from jax.experimental import pallas as pl
from jax.experimental.pallas import tpu as pltpu


CLIP_MEAN = (0.48145466, 0.4578275, 0.40821073)
CLIP_STD = (0.26862954, 0.26130258, 0.27577711)


# ----------------------------------------------------------------------------
# Kernel 1: de-normalization  (x * std + mean) * 255   on a (3, H*W) layout
# ----------------------------------------------------------------------------
def denorm_kernel(x_ref, o_ref):
    # x_ref / o_ref: (3, tile_hw) f32.  CLIP mean/std constants are baked in
    # via iota+select (pure VPU, no extra input DMAs); kernel is mem-bound.
    x = x_ref[...]
    ch = jax.lax.broadcasted_iota(jnp.int32, x.shape, 0)
    std = jnp.where(ch == 0, CLIP_STD[0],
                    jnp.where(ch == 1, CLIP_STD[1], CLIP_STD[2]))
    mean = jnp.where(ch == 0, CLIP_MEAN[0],
                     jnp.where(ch == 1, CLIP_MEAN[1], CLIP_MEAN[2]))
    o_ref[...] = (x * std + mean) * 255.0


def denormalize(x2d, *, tile_hw=16384):
    C, HW = x2d.shape
    if HW <= tile_hw:
        tile, hw_pad = HW, HW
    else:
        tile = tile_hw
        hw_pad = math.ceil(HW / tile) * tile
    xp = x2d if hw_pad == HW else jnp.pad(x2d, ((0, 0), (0, hw_pad - HW)))
    out = pl.pallas_call(
        denorm_kernel,
        out_shape=jax.ShapeDtypeStruct((C, hw_pad), jnp.float32),
        grid=(hw_pad // tile,),
        in_specs=[pl.BlockSpec((C, tile), lambda i: (0, i))],
        out_specs=pl.BlockSpec((C, tile), lambda i: (0, i)),
        compiler_params=pltpu.CompilerParams(
            dimension_semantics=("parallel",)),
    )(xp)
    return out[:, :HW]


# ----------------------------------------------------------------------------
# Kernel 2: folded SAM mask-logits matmul
#   out[(n*3 + m), hw] = hyper[(n*3 + m), :] @ image_embedding[:, hw]
# ----------------------------------------------------------------------------
def mask_matmul_kernel(hyper_ref, img_ref, out_ref):
    # hyper_ref: (3*tile_n, C) bf16   folded hypernetwork outputs (3 masks in M)
    # img_ref  : (C, tile_hw) bf16    image-embedding tile
    # out_ref  : (3*tile_n, tile_hw)  mask logits, lane-dense unmasked stores
    out_ref[...] = jnp.dot(hyper_ref[...], img_ref[...],
                           preferred_element_type=jnp.float32
                           ).astype(out_ref.dtype)


def sam_mask_logits(hyper_folded, img_emb, *, tile_n=128, tile_hw=2048,
                    out_dtype=jnp.float32):
    # hyper_folded: (3*N, C) bf16, row n*3+m = hypernetwork output of point n,
    # mask m.  img_emb: (C, HW) bf16.  Returns (3*N, HW) logits; the wrapper's
    # reshape to (N, 3, HW) is free (row-major identical).
    M, C = hyper_folded.shape
    C2, HW = img_emb.shape
    assert C == C2

    tile_m = 3 * tile_n
    if M <= tile_m:
        tile_m, m_pad = M, M
    else:
        m_pad = math.ceil(M / tile_m) * tile_m
    if HW <= tile_hw:
        tile_hw, hw_pad = HW, HW
    else:
        hw_pad = math.ceil(HW / tile_hw) * tile_hw

    h = (hyper_folded if m_pad == M
         else jnp.pad(hyper_folded, ((0, m_pad - M), (0, 0))))
    e = (img_emb if hw_pad == HW
         else jnp.pad(img_emb, ((0, 0), (0, hw_pad - HW))))

    out = pl.pallas_call(
        mask_matmul_kernel,
        out_shape=jax.ShapeDtypeStruct((m_pad, hw_pad), out_dtype),
        grid=(m_pad // tile_m, hw_pad // tile_hw),
        in_specs=[
            pl.BlockSpec((tile_m, C), lambda i, j: (i, 0)),
            pl.BlockSpec((C, tile_hw), lambda i, j: (0, j)),
        ],
        out_specs=pl.BlockSpec((tile_m, tile_hw), lambda i, j: (i, j)),
        compiler_params=pltpu.CompilerParams(
            dimension_semantics=("parallel", "parallel")),
    )(h, e)
    return out[:M, :HW]


# ----------------------------------------------------------------------------
# Glue reproducing the forward() structure
# ----------------------------------------------------------------------------
def build_point_grid(n_per_side):
    # SAM's build_all_layer_point_grids(16, 0, 1) -> one layer, 16x16 grid
    offset = 1.0 / (2 * n_per_side)
    pts_1d = np.linspace(offset, 1 - offset, n_per_side, dtype=np.float32)
    px = np.tile(pts_1d[None, :], (n_per_side, 1))
    py = np.tile(pts_1d[:, None], (1, n_per_side))
    return np.stack([px, py], axis=-1).reshape(-1, 2)  # (256, 2), (x, y)


def mask_model_forward(image, params):
    C_img, H, W = image.shape

    # (1) Pallas kernel: (x*std + mean)*255, lane-dense (3, H*W) layout.
    # TODO(synk): image_u8 only feeds the stubbed ViT-L encoder, so it is dead
    # work today; kept to mirror the module's forward().
    img255 = denormalize(image.reshape(C_img, H * W))
    image_u8 = jnp.transpose(img255.reshape(C_img, H, W),
                             (1, 2, 0)).astype(jnp.uint8)
    orig_h, orig_w = int(image_u8.shape[0]), int(image_u8.shape[1])

    # (2) generate_crop_boxes(orig_size, 0, 512/1500): n_layers=0 -> full image
    crop_boxes, layer_idxs = [[0, 0, orig_w, orig_h]], [0]
    point_grids = [build_point_grid(16)]
    points_per_batch = 256

    wh = params["wh"]                                   # (3, PE, C)
    PE, C_emb = wh.shape[1], wh.shape[2]
    bh = params["bh"].reshape(1, 3, C_emb)              # per-mask bias
    gauss = params["gauss"]                             # (2, PE//2)

    point_queries_out = None
    for crop_box, layer_idx in zip(crop_boxes, layer_idxs):
        x0, y0, x1, y1 = crop_box
        ch_, cw_ = y1 - y0, x1 - x0

        # TODO(synk): predictor.set_image (SAM ViT-L encoder from external
        # checkpoint) replaced with the deterministic synthetic embedding.
        img_emb = params["img_emb"].astype(jnp.bfloat16)  # (C_emb, ch*cw)

        points_scale = np.array([cw_, ch_], dtype=np.float32)[None, :]
        points_for_image = point_grids[layer_idx] * points_scale  # pixel (x,y)

        # (3) ResizeLongestSide(1024).apply_coords
        target_length = 1024
        scale = target_length / max(ch_, cw_)
        new_h, new_w = int(ch_ * scale + 0.5), int(cw_ * scale + 0.5)

        point_queries = []
        for s in range(0, points_for_image.shape[0], points_per_batch):
            points = points_for_image[s:s + points_per_batch]
            nb = points.shape[0]
            coords = points * np.array([new_w / cw_, new_h / ch_],
                                       np.float32)[None, :]
            # PositionEmbeddingRandom normalization -> [-1, 1]
            coords_norm = jnp.asarray(
                2.0 * coords / np.array([new_w, new_h], np.float32)[None, :]
                - 1.0, jnp.float32)

            # Hoisted out of the kernel (constant w.r.t. the image, tiny FLOP):
            # random-Fourier PE + stacked hypernetwork matmul + bias, folded to
            # (3*Nb, C) so the 3 masks live in the M dimension.
            proj = 2.0 * jnp.pi * (coords_norm @ gauss)        # (Nb, PE/2)
            pe = jnp.concatenate([jnp.sin(proj), jnp.cos(proj)], axis=-1)
            hyper = jnp.einsum('np,mpc->nmc', pe, wh,
                               preferred_element_type=jnp.float32) + bh
            hyper = hyper.reshape(nb * 3, C_emb).astype(jnp.bfloat16)

            # (4) Pallas kernel: one folded MXU dot, (3*Nb, HW) dense output.
            masks2d = sam_mask_logits(hyper, img_emb)          # (3*Nb, HW)
            point_queries.append(masks2d.reshape(nb, 3, ch_, cw_))

        point_queries_out = jnp.concatenate(point_queries, axis=0)

    # .squeeze(1): no-op here because dim 1 has size 3 (matches torch semantics)
    if point_queries_out.shape[1] == 1:
        point_queries_out = jnp.squeeze(point_queries_out, axis=1)
    return point_queries_out


if __name__ == "__main__":
    key = jax.random.PRNGKey(0)
    k_img, k_emb, k_g, k_w, k_b = jax.random.split(key, 5)

    C_img, H, W = 3, 16, 16     # small spatial size; point grid is 16x16 = 256
    C_emb, PE = 32, 256         # real SAM: C_emb=256, HW=64*64

    image = jax.random.normal(k_img, (C_img, H, W), jnp.float32)

    params = {
        "img_emb": jax.random.normal(k_emb, (C_emb, H * W), jnp.float32) * 0.1,
        "gauss": jax.random.normal(k_g, (2, PE // 2), jnp.float32),
        "wh": jax.random.normal(k_w, (3, PE, C_emb), jnp.float32)
              * (1.0 / np.sqrt(PE)),
        "bh": jax.random.normal(k_b, (3, 1, C_emb), jnp.float32) * 0.01,
    }

    out = mask_model_forward(image, params)
    out = jax.block_until_ready(out)
    assert out.shape == (256, 3, H, W), out.shape
    assert out.dtype == jnp.float32
    print("KERNEL_OK")
</pallas_src>

<mosaic_0001>
module attributes {stable_mosaic.version = 11 : i64} {
  func.func @denorm_kernel(%arg0: i32, %arg1: memref<3x256xf32, #tpu.memory_space<vmem>>, %arg2: memref<3x256xf32, #tpu.memory_space<vmem>>) attributes {dimension_semantics = [#tpu.dimension_semantics<parallel>], iteration_bounds = array<i64: 1>, scalar_prefetch = 0 : i64, scratch_operands = 0 : i64, tpu.core_type = #tpu.core_type<tc>, window_params = [{transform_indices = @transform_0, window_bounds = array<i64: 3, 256>}, {transform_indices = @transform_1, window_bounds = array<i64: 3, 256>}]} {
    %c0 = arith.constant 0 : index
    %c0_0 = arith.constant 0 : index
    %0 = vector.load %arg1[%c0, %c0_0] : memref<3x256xf32, #tpu.memory_space<vmem>>, vector<3x256xf32>
    %1 = tpu.iota {dimensions = array<i32: 0>} : vector<3x256xi32>
    %c0_i32 = arith.constant 0 : i32
    %2 = vector.broadcast %c0_i32 : i32 to vector<3x256xi32>
    %3 = arith.cmpi eq, %1, %2 : vector<3x256xi32>
    %c1_i32 = arith.constant 1 : i32
    %4 = vector.broadcast %c1_i32 : i32 to vector<3x256xi32>
    %5 = arith.cmpi eq, %1, %4 : vector<3x256xi32>
    %cst = arith.constant 0.26130259 : f32
    %cst_1 = arith.constant 0.275777102 : f32
    %6 = vector.broadcast %cst : f32 to vector<3x256xf32>
    %7 = vector.broadcast %cst_1 : f32 to vector<3x256xf32>
    %8 = arith.select %5, %6, %7 : vector<3x256xi1>, vector<3x256xf32>
    %cst_2 = arith.constant 0.268629551 : f32
    %9 = vector.broadcast %cst_2 : f32 to vector<3x256xf32>
    %10 = arith.select %3, %9, %8 : vector<3x256xi1>, vector<3x256xf32>
    %c0_i32_3 = arith.constant 0 : i32
    %11 = vector.broadcast %c0_i32_3 : i32 to vector<3x256xi32>
    %12 = arith.cmpi eq, %1, %11 : vector<3x256xi32>
    %c1_i32_4 = arith.constant 1 : i32
    %13 = vector.broadcast %c1_i32_4 : i32 to vector<3x256xi32>
    %14 = arith.cmpi eq, %1, %13 : vector<3x256xi32>
    %cst_5 = arith.constant 0.457827508 : f32
    %cst_6 = arith.constant 0.408210725 : f32
    %15 = vector.broadcast %cst_5 : f32 to vector<3x256xf32>
    %16 = vector.broadcast %cst_6 : f32 to vector<3x256xf32>
    %17 = arith.select %14, %15, %16 : vector<3x256xi1>, vector<3x256xf32>
    %cst_7 = arith.constant 0.48145467 : f32
    %18 = vector.broadcast %cst_7 : f32 to vector<3x256xf32>
    %19 = arith.select %12, %18, %17 : vector<3x256xi1>, vector<3x256xf32>
    %20 = arith.mulf %0, %10 : vector<3x256xf32>
    %21 = arith.addf %20, %19 : vector<3x256xf32>
    %cst_8 = arith.constant 2.550000e+02 : f32
    %22 = vector.broadcast %cst_8 : f32 to vector<3x256xf32>
    %23 = arith.mulf %21, %22 : vector<3x256xf32>
    %c0_9 = arith.constant 0 : index
    %c0_10 = arith.constant 0 : index
    %24 = vector.load %arg2[%c0_9, %c0_10] : memref<3x256xf32, #tpu.memory_space<vmem>>, vector<3x256xf32>
    tpu.vector_store %arg2[%c0_9, %c0_10], %23 {strides = array<i32>} : memref<3x256xf32, #tpu.memory_space<vmem>>, vector<3x256xf32>,
    return
  }
  func.func @transform_0(%arg0: i32) -> (i32, i32) {
    %c0_i32 = arith.constant 0 : i32
    %c0_i32_0 = arith.constant 0 : i32
    return %c0_i32, %arg0 : i32, i32
  }
  func.func @transform_1(%arg0: i32) -> (i32, i32) {
    %c0_i32 = arith.constant 0 : i32
    %c0_i32_0 = arith.constant 0 : i32
    return %c0_i32, %arg0 : i32, i32
  }
}

</mosaic_0001>

<bundles_post_ra>
// kernel: tpu_custom_call.1
= control target key start
LH: loop header
LB: loop body
LE: loop exit
PB: predicated region body
PF: predicated region fallthrough
CT: control target
= control target key end

     0   :  { %6 = vsyncpa [#allocation3], 0  ;;  %s137_s0 = inlined_call_operand.hbm [shape: f32[3,256], index: 0, kind: input, shape index: {}]   ;;  %s138_s1 = inlined_call_operand.hbm [shape: f32[3,256], index: 1, kind: output, shape index: {}]  }
   0x1   :  { %7 = vsyncpa [#allocation4], 0  ;;  %s116_s6 = smov [#allocation2]  }
   0x2   :  { %s14_s7 = sshll.u32 %s116_s6, 4  ;;  %s15_s7 = int_to_ptr.vmem [resolvable:$true] %s14_s7 }
   0x3   :  { %s80_s8 = scalar_lea.vmem %s15_s7, 128  ;;  %p85_p1 = scmp.lt.s32.totalorder %s15_s7, %s15_s7 }
   0x4   :  { %p81_p0 = scmp.ne.s32.totalorder %s15_s7, %s80_s8  ;;  %p86_p2 = scmp.lt.s32.totalorder %s80_s8, %s80_s8 }
   0x6   :  { %p87_p3 = por %p86_p2, %p85_p1 }
   0x8   :  { %p88_p4 = pnand %p87_p3, %p81_p0 }
   0xa   :  { %91 = shalt.err (!%p88_p4)
}
   0xb   :  { %17 = dma.hbm_to_vmem [thread:$0]  %s137_s0, 128, %s15_s7, [#allocation3]  }
   0xc   :  { %112 = dma.done.wait [#allocation3], 128  }
   0xd   :  { %113 = vsyncadd [#allocation3], 4294967168  ;;  %v22_v0 = vlaneseq  ;;  %v117_v2 = vmov 839922192   ;;  %v118_v5 = vmov 0.2757771  }
   0xe   :  { %v32_v3 = vunpack.c.l.s4 %v117_v2  ;;  %v119_v7 = vmov 0.40821072   ;;  %v21_v12 = vld [vmem:[#allocation2] sm:$0x77]  ;;  %s120_s0 = smov [#allocation5]  }
   0xf   :  { %v23_v1 = vshrl.u32 %v22_v0, 7  ;;  %s58_s11 = sshll.u32 %s120_s0, 4  ;;  %s59_s11 = int_to_ptr.vmem [resolvable:$true] %s58_s11 }
  0x10   :  { %v33_v4 = vunpack.c.0.s8 %v32_v3  ;;  %s92_s12 = scalar_lea.vmem %s59_s11, 128  ;;  %p97_p6 = scmp.lt.s32.totalorder %s59_s11, %s59_s11 }
  0x11   :  { %vm24_vm0 = vcmp.eq.s32.totalorder %v23_v1, 0  ;;  %vm25_vm1 = vcmp.eq.s32.totalorder %v23_v1, 1  ;;  %p93_p5 = scmp.ne.s32.totalorder %s59_s11, %s92_s12  ;;  %p98_p7 = scmp.lt.s32.totalorder %s92_s12, %s92_s12 }
  0x12   :  { %v26_v6 = vsel %vm25_vm1, 0.2613026, %v118_v5  ;;  %v28_v8 = vsel %vm25_vm1, 0.4578275, %v119_v7  ;;  %v36_v11 = vsub.s32 %v33_v4, %v23_v1 }
  0x13   :  { %v27_v9 = vsel %vm24_vm0, 0.26862955, %v26_v6  ;;  %v29_v10 = vsel %vm24_vm0, 0.48145467, %v28_v8  ;;  %p99_p8 = por %p98_p7, %p97_p6 }
  0x14   :  { %v37_v13 = vrot.slane %v27_v9, %v36_v11  ;;  %v47_v14 = vrot.slane %v29_v10, %v36_v11 }
  0x15   :  { %p100_p9 = pnand %p99_p8, %p93_p5 }
  0x16   :  { %v39_v15 = vmul.f32 %v37_v13, %v21_v12 }
  0x18   :  { %v49_v16 = vadd.f32 %v47_v14, %v39_v15 }
  0x1a   :  { %v50_v17 = vmul.f32 255.0, %v49_v16 }
  0x1c   :  { %51 = vst [vmem:[#allocation5] sm:$0x77] %v50_v17 }
  0x1d   :  { %103 = shalt.err (!%p100_p9)
}
  0x1e   :  { %61 = dma.vmem_to_hbm [thread:$0]  %s59_s11, 128, %s138_s1, [#allocation4]  }
  0x1f   :  { %114 = dma.done.wait [#allocation4], 128  }
  0x20   :  { %115 = vsyncadd [#allocation4], 4294967168 }
  0x21   :  { %65 = vsyncpa [#allocation3], 1 }
  0x22   :  { %66 = vsyncpa [#allocation4], 1 }

</bundles_post_ra>
